<compile_context>
chip_gen: v5e
topology: v5e:2x2
jax: 0.10.0
libtpu: 0.0.40
codegen_flags: <defaults>
</compile_context>

<pallas_src>
import jax
import jax.numpy as jnp
from jax.experimental import pallas as pl
from jax.experimental.pallas import tpu as pltpu


_LANE = 128
_SUBLANE = 8


def _round_up(n, m):
    return ((n + m - 1) // m) * m


# ---------------------------------------------------------------------------
# Hardware / capability queries (cached)
# ---------------------------------------------------------------------------

_VMEM_CAP = None
_SINGLE_BUFFER_OK = None


def _vmem_capacity():
    """Physical VMEM per core, with a conservative (v7x) fallback."""
    global _VMEM_CAP
    if _VMEM_CAP is None:
        try:
            _VMEM_CAP = int(pltpu.get_tpu_info().vmem_capacity_bytes)
        except Exception:
            _VMEM_CAP = 64 << 20  # conservative: v7x per-TC VMEM
    return _VMEM_CAP


def _probe_kernel(x_ref, w_ref, o_ref):
    o_ref[...] = x_ref[...] + w_ref[...]


def _single_buffer_supported():
    """Probe whether constant-index BlockSpecs accept pl.Buffered(1)."""
    global _SINGLE_BUFFER_OK
    if _SINGLE_BUFFER_OK is None:
        try:
            x = jnp.ones((16, 128), jnp.float32)
            w = jnp.ones((8, 128), jnp.float32)
            out = pl.pallas_call(
                _probe_kernel,
                out_shape=jax.ShapeDtypeStruct((16, 128), jnp.float32),
                grid=(2,),
                in_specs=[
                    pl.BlockSpec((8, 128), lambda i: (i, 0)),
                    pl.BlockSpec((8, 128), lambda i: (0, 0),
                                 pipeline_mode=pl.Buffered(1)),
                ],
                out_specs=pl.BlockSpec((8, 128), lambda i: (i, 0)),
            )(x, w)
            jax.block_until_ready(out)
            _SINGLE_BUFFER_OK = bool(jnp.allclose(out, 2.0))
        except Exception:  # Pallas without Buffered(1) support -> double buffer
            _SINGLE_BUFFER_OK = False
    return _SINGLE_BUFFER_OK


# ---------------------------------------------------------------------------
# Layer bookkeeping helpers
# ---------------------------------------------------------------------------

def _weight_names(d):
    if d["kind"] == "block":
        return ["w1", "w2"] + (["ws"] if d["has_proj"] else [])
    return ["w"]


def _bias_names(d):
    if d["kind"] == "block":
        return ["b1", "b2"] + (["bs"] if d["has_proj"] else [])
    return ["b"]


def _group_param_bytes(descs):
    total = 0
    for d in descs:
        for name in _weight_names(d) + _bias_names(d):
            arr = d[name]
            total += arr.size * arr.dtype.itemsize
    return total


def _auto_weight_budget(single_buffer):
    """Per-group parameter budget: VMEM capacity minus headroom / activations,
    divided by the effective buffer count."""
    cap = _vmem_capacity()
    buf = 1 if single_buffer else 2
    usable = cap - (12 << 20)       # compiler / pipeline headroom
    act_reserve = 24 << 20          # activation tiles + f32 intermediates
    return max(8 << 20, (usable - act_reserve) // buf)


def _partition_layers(layers, budget):
    groups, cur, cur_bytes = [], [], 0
    for d in layers:
        lb = _group_param_bytes([d])
        if cur and cur_bytes + lb > budget:
            groups.append(cur)
            cur, cur_bytes = [], 0
        cur.append(d)
        cur_bytes += lb
    if cur:
        groups.append(cur)
    # TODO(synk): K/N-tile a single layer whose padded bf16 weights alone exceed
    # the budget (input_dim > ~2048 on v7x) with an f32 accumulator scratch
    # instead of forcing another group split.
    return groups


def _group_starts_matmul_only(d):
    """True if the group's first layer only feeds its input into matmuls,
    so the incoming activation can be carried in bf16 exactly."""
    return d["kind"] == "linear" or d["has_proj"]


# ---------------------------------------------------------------------------
# Fused kernel (chains residual blocks + classifier inside one body)
# ---------------------------------------------------------------------------

def _make_group_kernel(descs, bias_slices):
    def kernel(*refs):
        x_ref = refs[0]
        b_ref = refs[1]
        o_ref = refs[-1]
        w_refs = refs[2:-1]

        def bias(sl):
            off, width = sl
            return b_ref[:, off:off + width]          # (1, width) f32, static slice

        h = x_ref[...]                                 # f32 or bf16 activations
        wi = 0
        for d, bsl in zip(descs, bias_slices):
            # Hoist a single bf16 cast per layer, reused by main + shortcut paths.
            h_bf = h if h.dtype == jnp.bfloat16 else h.astype(jnp.bfloat16)
            if d["kind"] == "block":
                w1, w2 = w_refs[wi], w_refs[wi + 1]
                wi += 2
                a = jnp.dot(h_bf, w1[...],
                            preferred_element_type=jnp.float32) + bias(bsl[0])
                a = jnp.maximum(a, 0.0)                # ReLU (Dropout = id @ eval)
                out = jnp.dot(a.astype(jnp.bfloat16), w2[...],
                              preferred_element_type=jnp.float32) + bias(bsl[1])
                if d["has_proj"]:
                    ws = w_refs[wi]
                    wi += 1
                    res = jnp.dot(h_bf, ws[...],
                                  preferred_element_type=jnp.float32) + bias(bsl[2])
                else:                                  # identity shortcut (f32)
                    res = h
                h = jnp.maximum(out + res, 0.0)        # final ReLU
            else:                                      # classifier Linear
                w = w_refs[wi]
                wi += 1
                h = jnp.dot(h_bf, w[...],
                            preferred_element_type=jnp.float32) + bias(bsl[0])
        o_ref[...] = h.astype(o_ref.dtype)
    return kernel


def _const_spec(shape, single_buffer):
    if single_buffer:
        return pl.BlockSpec(shape, lambda i: (0, 0), pipeline_mode=pl.Buffered(1))
    return pl.BlockSpec(shape, lambda i: (0, 0))


def _fused_group_forward(x_pad, descs, *, bm, out_dtype, single_buffer):
    B_pad, in_pad = x_pad.shape
    out_pad = descs[-1]["out_pad"]

    # Concatenate all biases of the group into one lane-aligned (1, total) array.
    bias_slices, pieces, off = [], [], 0
    for d in descs:
        sls = []
        for name in _bias_names(d):
            b = d[name]                               # (1, width) f32, width % 128 == 0
            sls.append((off, b.shape[1]))
            pieces.append(b)
            off += b.shape[1]
        bias_slices.append(tuple(sls))
    bias_all = jnp.concatenate(pieces, axis=1)

    args = [x_pad, bias_all]
    in_specs = [pl.BlockSpec((bm, in_pad), lambda i: (i, 0)),
                _const_spec(bias_all.shape, single_buffer)]
    # TODO(synk): stream weights per layer (pl.ANY + pltpu.emit_pipeline /
    # make_async_copy double-buffer) so layer k+1's weight DMA overlaps layer
    # k's matmul when a group carries tens of MiB of weights for a single tile.
    for d in descs:
        for name in _weight_names(d):
            arr = d[name]
            args.append(arr)
            in_specs.append(_const_spec(arr.shape, single_buffer))

    # VMEM budget: parameters (x buffer count) + activation tiles + intermediates,
    # clamped below the chip's physical capacity minus headroom.
    buf = 1 if single_buffer else 2
    w_bytes = _group_param_bytes(descs) * buf
    max_w = max(max(d[n].shape[-1] for n in _weight_names(d)) for d in descs)
    act_bytes = (2 * bm * in_pad * x_pad.dtype.itemsize
                 + 2 * bm * out_pad * jnp.dtype(out_dtype).itemsize
                 + 8 * 4 * bm * max_w)
    cap = _vmem_capacity()
    vmem_limit = int(max(16 << 20,
                         min(w_bytes + act_bytes + (4 << 20), cap - (8 << 20))))

    return pl.pallas_call(
        _make_group_kernel(descs, bias_slices),
        out_shape=jax.ShapeDtypeStruct((B_pad, out_pad), out_dtype),
        grid=(B_pad // bm,),
        in_specs=in_specs,
        out_specs=pl.BlockSpec((bm, out_pad), lambda i: (i, 0)),
        compiler_params=pltpu.CompilerParams(
            dimension_semantics=("parallel",),
            vmem_limit_bytes=vmem_limit),
    )(*args)


# ---------------------------------------------------------------------------
# Top-level forward
# ---------------------------------------------------------------------------

def residual_classifier_forward(x, params, *, block_m=None):
    B, in_dim = x.shape
    dims = params["dims"]
    assert in_dim == dims["input_dim"]
    in_pad = dims["input_pad"]
    num_classes = dims["num_classes"]

    single_buffer = _single_buffer_supported()

    # Batch tile: multiple of 8 sublanes, <=256; single grid step for small
    # batches (no padding-only tiles), natural multi-tile split (and v7x
    # megacore sharding) only appears once B > 256.
    b8 = _round_up(B, _SUBLANE)
    if block_m is not None:
        bm = max(_SUBLANE, _round_up(block_m, _SUBLANE))
    else:
        bm = min(256, b8)
    n_tiles = pl.cdiv(b8, bm)
    B_pad = n_tiles * bm

    layers = params["layers"]
    groups = _partition_layers(layers, _auto_weight_budget(single_buffer))

    # Carry the input in bf16 when the first layer only feeds matmuls
    # (projection shortcut / plain Linear): numerically identical, half the DMA.
    first = groups[0][0]
    x_dtype = jnp.bfloat16 if _group_starts_matmul_only(first) else jnp.float32
    h = jnp.pad(x.astype(jnp.float32),
                ((0, B_pad - B), (0, in_pad - in_dim))).astype(x_dtype)

    for gi, group in enumerate(groups):
        if gi == len(groups) - 1:
            out_dtype = jnp.float32                   # logits stay f32
        else:
            nxt = groups[gi + 1][0]
            out_dtype = (jnp.bfloat16 if _group_starts_matmul_only(nxt)
                         else jnp.float32)
        h = _fused_group_forward(h, group, bm=bm, out_dtype=out_dtype,
                                 single_buffer=single_buffer)

    return h[:B, :num_classes]


# ---------------------------------------------------------------------------
# Deterministic parameter construction (mirrors __init__ + _initialize_weights)
# ---------------------------------------------------------------------------

def _kaiming_fan_out(key, in_dim, out_dim):
    # kaiming_normal_(mode='fan_out', nonlinearity='relu') on PyTorch's (out, in)
    # weight, stored transposed as (in, out): std = sqrt(2 / fan_out) = sqrt(2/out_dim)
    std = (2.0 / out_dim) ** 0.5
    return jax.random.normal(key, (in_dim, out_dim), jnp.float32) * std


def _pad_weight(w, in_pad, out_pad):
    return jnp.pad(w, ((0, in_pad - w.shape[0]),
                       (0, out_pad - w.shape[1]))).astype(jnp.bfloat16)


def init_residual_classifier(key, input_dim, num_classes, hidden_dims=None):
    if hidden_dims is None:
        if input_dim > 2048:
            hidden_dims = [2048, 1024, 512, 256]
        elif input_dim > 1024:
            hidden_dims = [1024, 512, 256]
        else:
            hidden_dims = [512, 256]

    layers = []
    prev = input_dim
    for hd in hidden_dims:
        in_dim, out_dim = prev, hd
        hidden_dim = max(in_dim, out_dim) // 2          # ResidualBlock default
        in_p = _round_up(in_dim, _LANE)
        hid_p = _round_up(hidden_dim, _LANE)
        out_p = _round_up(out_dim, _LANE)
        key, k1, k2, k3 = jax.random.split(key, 4)
        w1 = _kaiming_fan_out(k1, in_dim, hidden_dim)
        w2 = _kaiming_fan_out(k2, hidden_dim, out_dim)
        d = {
            "kind": "block",
            "has_proj": in_dim != out_dim,
            "dims": (in_dim, hidden_dim, out_dim),
            "out_pad": out_p,
            "w1": _pad_weight(w1, in_p, hid_p),
            "b1": jnp.zeros((1, hid_p), jnp.float32),    # bias init = 0
            "w2": _pad_weight(w2, hid_p, out_p),
            "b2": jnp.zeros((1, out_p), jnp.float32),
            "w1_f32": w1, "w2_f32": w2,
        }
        if d["has_proj"]:
            ws = _kaiming_fan_out(k3, in_dim, out_dim)
            d["ws"] = _pad_weight(ws, in_p, out_p)
            d["bs"] = jnp.zeros((1, out_p), jnp.float32)
            d["ws_f32"] = ws
        layers.append(d)
        prev = hd

    key, kc = jax.random.split(key)
    in_p = _round_up(prev, _LANE)
    out_p = _round_up(num_classes, _LANE)
    wc = _kaiming_fan_out(kc, prev, num_classes)
    layers.append({
        "kind": "linear",
        "dims": (prev, num_classes),
        "out_pad": out_p,
        "w": _pad_weight(wc, in_p, out_p),
        "b": jnp.zeros((1, out_p), jnp.float32),
        "w_f32": wc,
    })

    return {
        "layers": layers,
        "dims": {"input_dim": input_dim,
                 "input_pad": _round_up(input_dim, _LANE),
                 "num_classes": num_classes},
    }


# ---------------------------------------------------------------------------
# Pure-JAX references: bf16-consistent (tight check) and fp32 (loose check)
# ---------------------------------------------------------------------------

def _bdot(x, w_bf16):
    return jnp.dot(x.astype(jnp.bfloat16), w_bf16,
                   preferred_element_type=jnp.float32)


def _reference_forward_bf16(x, params):
    h = x.astype(jnp.float32)
    for d in params["layers"]:
        if d["kind"] == "block":
            in_dim, hid, out_dim = d["dims"]
            a = jnp.maximum(_bdot(h, d["w1"][:in_dim, :hid]) + d["b1"][:, :hid], 0.0)
            out = _bdot(a, d["w2"][:hid, :out_dim]) + d["b2"][:, :out_dim]
            if d["has_proj"]:
                res = _bdot(h, d["ws"][:in_dim, :out_dim]) + d["bs"][:, :out_dim]
            else:
                res = h
            h = jnp.maximum(out + res, 0.0)
        else:
            in_dim, ncls = d["dims"]
            h = _bdot(h, d["w"][:in_dim, :ncls]) + d["b"][:, :ncls]
    return h


def _reference_forward_f32(x, params):
    h = x.astype(jnp.float32)
    for d in params["layers"]:
        if d["kind"] == "block":
            _, hid, out_dim = d["dims"]
            a = jnp.maximum(h @ d["w1_f32"] + d["b1"][:, :hid], 0.0)
            out = a @ d["w2_f32"] + d["b2"][:, :out_dim]
            if d["has_proj"]:
                res = h @ d["ws_f32"] + d["bs"][:, :out_dim]
            else:
                res = h
            h = jnp.maximum(out + res, 0.0)
        else:
            _, ncls = d["dims"]
            h = h @ d["w_f32"] + d["b"][:, :ncls]
    return h


# ---------------------------------------------------------------------------
# Main
# ---------------------------------------------------------------------------

if __name__ == "__main__":
    key = jax.random.PRNGKey(0)

    batch = 8
    input_dim = 128
    num_classes = 6
    hidden_dims = [128, 64]   # exercises both identity and projection shortcuts

    key, kx, kp = jax.random.split(key, 3)
    x = jax.random.normal(kx, (batch, input_dim), jnp.float32)
    params = init_residual_classifier(kp, input_dim, num_classes, hidden_dims)

    logits = residual_classifier_forward(x, params)
    logits = jax.block_until_ready(logits)
    assert logits.shape == (batch, num_classes)

    # Tight check against a reference using the exact same bf16 weights / f32 accumulation.
    ref_bf16 = _reference_forward_bf16(x, params)
    assert jnp.allclose(logits, ref_bf16, atol=1e-2, rtol=1e-2), \
        "mismatch vs bf16-consistent reference"

    # Loose check against the true fp32 PyTorch-equivalent forward (bf16 weight drift).
    ref_f32 = _reference_forward_f32(x, params)
    scale = float(jnp.max(jnp.abs(ref_f32))) + 1e-6
    max_err = float(jnp.max(jnp.abs(logits - ref_f32)))
    assert max_err <= 0.05 * scale, \
        f"fp32 drift too large: max_err={max_err:.4f} scale={scale:.4f}"

    print("KERNEL_OK")
</pallas_src>

<mosaic_0001>
module attributes {stable_mosaic.version = 11 : i64} {
  func.func @_probe_kernel(%arg0: i32, %arg1: memref<8x128xf32, #tpu.memory_space<vmem>>, %arg2: memref<8x128xf32, #tpu.memory_space<vmem>>, %arg3: memref<8x128xf32, #tpu.memory_space<vmem>>) attributes {dimension_semantics = [#tpu.dimension_semantics<arbitrary>], iteration_bounds = array<i64: 2>, scalar_prefetch = 0 : i64, scratch_operands = 0 : i64, tpu.core_type = #tpu.core_type<tc>, window_params = [{transform_indices = @transform_0, window_bounds = array<i64: 8, 128>}, {pipeline_mode = #tpu.pipeline_mode<synchronous>, transform_indices = @transform_1, window_bounds = array<i64: 8, 128>}, {transform_indices = @transform_2, window_bounds = array<i64: 8, 128>}]} {
    %c0 = arith.constant 0 : index
    %c0_0 = arith.constant 0 : index
    %0 = vector.load %arg1[%c0, %c0_0] : memref<8x128xf32, #tpu.memory_space<vmem>>, vector<8x128xf32>
    %c0_1 = arith.constant 0 : index
    %c0_2 = arith.constant 0 : index
    %1 = vector.load %arg2[%c0_1, %c0_2] : memref<8x128xf32, #tpu.memory_space<vmem>>, vector<8x128xf32>
    %2 = arith.addf %0, %1 : vector<8x128xf32>
    %c0_3 = arith.constant 0 : index
    %c0_4 = arith.constant 0 : index
    %3 = vector.load %arg3[%c0_3, %c0_4] : memref<8x128xf32, #tpu.memory_space<vmem>>, vector<8x128xf32>
    tpu.vector_store %arg3[%c0_3, %c0_4], %2 {strides = array<i32>} : memref<8x128xf32, #tpu.memory_space<vmem>>, vector<8x128xf32>,
    return
  }
  func.func @transform_0(%arg0: i32) -> (i32, i32) {
    %c0_i32 = arith.constant 0 : i32
    %c0_i32_0 = arith.constant 0 : i32
    return %arg0, %c0_i32 : i32, i32
  }
  func.func @transform_1(%arg0: i32) -> (i32, i32) {
    %c0_i32 = arith.constant 0 : i32
    %c0_i32_0 = arith.constant 0 : i32
    %c0_i32_1 = arith.constant 0 : i32
    return %c0_i32, %c0_i32_0 : i32, i32
  }
  func.func @transform_2(%arg0: i32) -> (i32, i32) {
    %c0_i32 = arith.constant 0 : i32
    %c0_i32_0 = arith.constant 0 : i32
    return %arg0, %c0_i32 : i32, i32
  }
}

module attributes {stable_mosaic.version = 11 : i64} {
  func.func @kernel(%arg0: i32, %arg1: memref<8x128xf32, #tpu.memory_space<vmem>>, %arg2: memref<1x768xf32, #tpu.memory_space<vmem>>, %arg3: memref<128x128xbf16, #tpu.memory_space<vmem>>, %arg4: memref<128x128xbf16, #tpu.memory_space<vmem>>, %arg5: memref<128x128xbf16, #tpu.memory_space<vmem>>, %arg6: memref<128x128xbf16, #tpu.memory_space<vmem>>, %arg7: memref<128x128xbf16, #tpu.memory_space<vmem>>, %arg8: memref<128x128xbf16, #tpu.memory_space<vmem>>, %arg9: memref<8x128xf32, #tpu.memory_space<vmem>>) attributes {dimension_semantics = [#tpu.dimension_semantics<parallel>], iteration_bounds = array<i64: 1>, scalar_prefetch = 0 : i64, scratch_operands = 0 : i64, tpu.core_type = #tpu.core_type<tc>, window_params = [{transform_indices = @transform_0, window_bounds = array<i64: 8, 128>}, {pipeline_mode = #tpu.pipeline_mode<synchronous>, transform_indices = @transform_1, window_bounds = array<i64: 1, 768>}, {pipeline_mode = #tpu.pipeline_mode<synchronous>, transform_indices = @transform_2, window_bounds = array<i64: 128, 128>}, {pipeline_mode = #tpu.pipeline_mode<synchronous>, transform_indices = @transform_3, window_bounds = array<i64: 128, 128>}, {pipeline_mode = #tpu.pipeline_mode<synchronous>, transform_indices = @transform_4, window_bounds = array<i64: 128, 128>}, {pipeline_mode = #tpu.pipeline_mode<synchronous>, transform_indices = @transform_5, window_bounds = array<i64: 128, 128>}, {pipeline_mode = #tpu.pipeline_mode<synchronous>, transform_indices = @transform_6, window_bounds = array<i64: 128, 128>}, {pipeline_mode = #tpu.pipeline_mode<synchronous>, transform_indices = @transform_7, window_bounds = array<i64: 128, 128>}, {transform_indices = @transform_8, window_bounds = array<i64: 8, 128>}]} {
    %c0 = arith.constant 0 : index
    %c0_0 = arith.constant 0 : index
    %0 = vector.load %arg1[%c0, %c0_0] : memref<8x128xf32, #tpu.memory_space<vmem>>, vector<8x128xf32>
    %1 = arith.truncf %0 : vector<8x128xf32> to vector<8x128xbf16>
    %c0_1 = arith.constant 0 : index
    %c0_2 = arith.constant 0 : index
    %2 = vector.load %arg3[%c0_1, %c0_2] : memref<128x128xbf16, #tpu.memory_space<vmem>>, vector<128x128xbf16>
    %cst = arith.constant dense<0.000000e+00> : vector<8x128xf32>
    %3 = tpu.matmul %1, %2, %cst {dimension_numbers = #tpu.dot_dimension_numbers<[1], [0], [0], [1], [0, 0, 1, 1], [], []>} : vector<8x128xbf16>, vector<128x128xbf16>, vector<8x128xf32> -> vector<8x128xf32>
    %c0_3 = arith.constant 0 : index
    %c0_4 = arith.constant 0 : index
    %4 = vector.load %arg2[%c0_3, %c0_4] : memref<1x768xf32, #tpu.memory_space<vmem>>, vector<1x128xf32>
    %5 = vector.broadcast %4 : vector<1x128xf32> to vector<8x128xf32>
    %6 = arith.addf %3, %5 : vector<8x128xf32>
    %cst_5 = arith.constant 0.000000e+00 : f32
    %7 = vector.broadcast %cst_5 : f32 to vector<8x128xf32>
    %8 = arith.maximumf %6, %7 : vector<8x128xf32>
    %9 = arith.truncf %8 : vector<8x128xf32> to vector<8x128xbf16>
    %c0_6 = arith.constant 0 : index
    %c0_7 = arith.constant 0 : index
    %10 = vector.load %arg4[%c0_6, %c0_7] : memref<128x128xbf16, #tpu.memory_space<vmem>>, vector<128x128xbf16>
    %cst_8 = arith.constant dense<0.000000e+00> : vector<8x128xf32>
    %11 = tpu.matmul %9, %10, %cst_8 {dimension_numbers = #tpu.dot_dimension_numbers<[1], [0], [0], [1], [0, 0, 1, 1], [], []>} : vector<8x128xbf16>, vector<128x128xbf16>, vector<8x128xf32> -> vector<8x128xf32>
    %c0_9 = arith.constant 0 : index
    %c128 = arith.constant 128 : index
    %12 = vector.load %arg2[%c0_9, %c128] : memref<1x768xf32, #tpu.memory_space<vmem>>, vector<1x128xf32>
    %13 = vector.broadcast %12 : vector<1x128xf32> to vector<8x128xf32>
    %14 = arith.addf %11, %13 : vector<8x128xf32>
    %15 = arith.addf %14, %0 : vector<8x128xf32>
    %cst_10 = arith.constant 0.000000e+00 : f32
    %16 = vector.broadcast %cst_10 : f32 to vector<8x128xf32>
    %17 = arith.maximumf %15, %16 : vector<8x128xf32>
    %18 = arith.truncf %17 : vector<8x128xf32> to vector<8x128xbf16>
    %c0_11 = arith.constant 0 : index
    %c0_12 = arith.constant 0 : index
    %19 = vector.load %arg5[%c0_11, %c0_12] : memref<128x128xbf16, #tpu.memory_space<vmem>>, vector<128x128xbf16>
    %cst_13 = arith.constant dense<0.000000e+00> : vector<8x128xf32>
    %20 = tpu.matmul %18, %19, %cst_13 {dimension_numbers = #tpu.dot_dimension_numbers<[1], [0], [0], [1], [0, 0, 1, 1], [], []>} : vector<8x128xbf16>, vector<128x128xbf16>, vector<8x128xf32> -> vector<8x128xf32>
    %c0_14 = arith.constant 0 : index
    %c256 = arith.constant 256 : index
    %21 = vector.load %arg2[%c0_14, %c256] : memref<1x768xf32, #tpu.memory_space<vmem>>, vector<1x128xf32>
    %22 = vector.broadcast %21 : vector<1x128xf32> to vector<8x128xf32>
    %23 = arith.addf %20, %22 : vector<8x128xf32>
    %cst_15 = arith.constant 0.000000e+00 : f32
    %24 = vector.broadcast %cst_15 : f32 to vector<8x128xf32>
    %25 = arith.maximumf %23, %24 : vector<8x128xf32>
    %26 = arith.truncf %25 : vector<8x128xf32> to vector<8x128xbf16>
    %c0_16 = arith.constant 0 : index
    %c0_17 = arith.constant 0 : index
    %27 = vector.load %arg6[%c0_16, %c0_17] : memref<128x128xbf16, #tpu.memory_space<vmem>>, vector<128x128xbf16>
    %cst_18 = arith.constant dense<0.000000e+00> : vector<8x128xf32>
    %28 = tpu.matmul %26, %27, %cst_18 {dimension_numbers = #tpu.dot_dimension_numbers<[1], [0], [0], [1], [0, 0, 1, 1], [], []>} : vector<8x128xbf16>, vector<128x128xbf16>, vector<8x128xf32> -> vector<8x128xf32>
    %c0_19 = arith.constant 0 : index
    %c384 = arith.constant 384 : index
    %29 = vector.load %arg2[%c0_19, %c384] : memref<1x768xf32, #tpu.memory_space<vmem>>, vector<1x128xf32>
    %30 = vector.broadcast %29 : vector<1x128xf32> to vector<8x128xf32>
    %31 = arith.addf %28, %30 : vector<8x128xf32>
    %c0_20 = arith.constant 0 : index
    %c0_21 = arith.constant 0 : index
    %32 = vector.load %arg7[%c0_20, %c0_21] : memref<128x128xbf16, #tpu.memory_space<vmem>>, vector<128x128xbf16>
    %cst_22 = arith.constant dense<0.000000e+00> : vector<8x128xf32>
    %33 = tpu.matmul %18, %32, %cst_22 {dimension_numbers = #tpu.dot_dimension_numbers<[1], [0], [0], [1], [0, 0, 1, 1], [], []>} : vector<8x128xbf16>, vector<128x128xbf16>, vector<8x128xf32> -> vector<8x128xf32>
    %c0_23 = arith.constant 0 : index
    %c512 = arith.constant 512 : index
    %34 = vector.load %arg2[%c0_23, %c512] : memref<1x768xf32, #tpu.memory_space<vmem>>, vector<1x128xf32>
    %35 = vector.broadcast %34 : vector<1x128xf32> to vector<8x128xf32>
    %36 = arith.addf %33, %35 : vector<8x128xf32>
    %37 = arith.addf %31, %36 : vector<8x128xf32>
    %cst_24 = arith.constant 0.000000e+00 : f32
    %38 = vector.broadcast %cst_24 : f32 to vector<8x128xf32>
    %39 = arith.maximumf %37, %38 : vector<8x128xf32>
    %40 = arith.truncf %39 : vector<8x128xf32> to vector<8x128xbf16>
    %c0_25 = arith.constant 0 : index
    %c0_26 = arith.constant 0 : index
    %41 = vector.load %arg8[%c0_25, %c0_26] : memref<128x128xbf16, #tpu.memory_space<vmem>>, vector<128x128xbf16>
    %cst_27 = arith.constant dense<0.000000e+00> : vector<8x128xf32>
    %42 = tpu.matmul %40, %41, %cst_27 {dimension_numbers = #tpu.dot_dimension_numbers<[1], [0], [0], [1], [0, 0, 1, 1], [], []>} : vector<8x128xbf16>, vector<128x128xbf16>, vector<8x128xf32> -> vector<8x128xf32>
    %c0_28 = arith.constant 0 : index
    %c640 = arith.constant 640 : index
    %43 = vector.load %arg2[%c0_28, %c640] : memref<1x768xf32, #tpu.memory_space<vmem>>, vector<1x128xf32>
    %44 = vector.broadcast %43 : vector<1x128xf32> to vector<8x128xf32>
    %45 = arith.addf %42, %44 : vector<8x128xf32>
    %c0_29 = arith.constant 0 : index
    %c0_30 = arith.constant 0 : index
    %46 = vector.load %arg9[%c0_29, %c0_30] : memref<8x128xf32, #tpu.memory_space<vmem>>, vector<8x128xf32>
    tpu.vector_store %arg9[%c0_29, %c0_30], %45 {strides = array<i32>} : memref<8x128xf32, #tpu.memory_space<vmem>>, vector<8x128xf32>,
    return
  }
  func.func @transform_0(%arg0: i32) -> (i32, i32) {
    %c0_i32 = arith.constant 0 : i32
    %c0_i32_0 = arith.constant 0 : i32
    return %arg0, %c0_i32 : i32, i32
  }
  func.func @transform_1(%arg0: i32) -> (i32, i32) {
    %c0_i32 = arith.constant 0 : i32
    %c0_i32_0 = arith.constant 0 : i32
    %c0_i32_1 = arith.constant 0 : i32
    return %c0_i32, %c0_i32_0 : i32, i32
  }
  func.func @transform_2(%arg0: i32) -> (i32, i32) {
    %c0_i32 = arith.constant 0 : i32
    %c0_i32_0 = arith.constant 0 : i32
    %c0_i32_1 = arith.constant 0 : i32
    return %c0_i32, %c0_i32_0 : i32, i32
  }
  func.func @transform_3(%arg0: i32) -> (i32, i32) {
    %c0_i32 = arith.constant 0 : i32
    %c0_i32_0 = arith.constant 0 : i32
    %c0_i32_1 = arith.constant 0 : i32
    return %c0_i32, %c0_i32_0 : i32, i32
  }
  func.func @transform_4(%arg0: i32) -> (i32, i32) {
    %c0_i32 = arith.constant 0 : i32
    %c0_i32_0 = arith.constant 0 : i32
    %c0_i32_1 = arith.constant 0 : i32
    return %c0_i32, %c0_i32_0 : i32, i32
  }
  func.func @transform_5(%arg0: i32) -> (i32, i32) {
    %c0_i32 = arith.constant 0 : i32
    %c0_i32_0 = arith.constant 0 : i32
    %c0_i32_1 = arith.constant 0 : i32
    return %c0_i32, %c0_i32_0 : i32, i32
  }
  func.func @transform_6(%arg0: i32) -> (i32, i32) {
    %c0_i32 = arith.constant 0 : i32
    %c0_i32_0 = arith.constant 0 : i32
    %c0_i32_1 = arith.constant 0 : i32
    return %c0_i32, %c0_i32_0 : i32, i32
  }
  func.func @transform_7(%arg0: i32) -> (i32, i32) {
    %c0_i32 = arith.constant 0 : i32
    %c0_i32_0 = arith.constant 0 : i32
    %c0_i32_1 = arith.constant 0 : i32
    return %c0_i32, %c0_i32_0 : i32, i32
  }
  func.func @transform_8(%arg0: i32) -> (i32, i32) {
    %c0_i32 = arith.constant 0 : i32
    %c0_i32_0 = arith.constant 0 : i32
    return %arg0, %c0_i32 : i32, i32
  }
}

</mosaic_0001>

<bundles_post_ra>
// kernel: tpu_custom_call.1
= control target key start
LH: loop header
LB: loop body
LE: loop exit
PB: predicated region body
PF: predicated region fallthrough
CT: control target
= control target key end

     0   :  { %7 = vsyncpa [#allocation3], 0  ;;  %s633_s0 = inlined_call_operand.hbm [shape: f32[16,128], index: 0, kind: input, shape index: {}]   ;;  %s634_s1 = inlined_call_operand.hbm [shape: f32[8,128], index: 1, kind: input, shape index: {}]   ;;  %s635_s2 = inlined_call_operand.hbm [shape: f32[16,128], index: 2, kind: output, shape index: {}]  }
   0x1   :  { %9 = vsyncpa [#allocation3 + $0x1], 0 }
   0x2   :  { %10 = vsyncpa [#allocation6], 0 }
   0x3   :  { %11 = vsyncpa [#allocation4], 0 }
   0x4   :  { %13 = vsyncpa [#allocation4 + $0x1], 0  ;;  %s495_s9 = smov 0   ;;  %s497_s10 = smov 0  }
   0x5   :  { %s499_s11 = smov 0   ;;  %s501_s12 = smov 0  }
   0x6 LB: > { %s516_s13 = sadd.s32 4294967295, %s477_s12   ;;  %s276_s14 = sadd.s32 4294967294, %s477_s12   ;;  %s477_s12 = sphi %s501_s12, %s645_s12   ;;  %s473_s11 = sphi %s499_s11, %s644_s11   ;;  %s469_s10 = sphi %s497_s10, %s643_s10   ;;  %s465_s9 = sphi %s495_s9, %s642_s9  }
   0x7   : > { %p39_p0 = scmp.ne.s32.totalorder %s469_s10, %s465_s9  ;;  %p40_p1 = scmp.eq.s32.totalorder %s516_s13, 0 }
   0x8   : > { %p84_p2 = scmp.eq.s32.totalorder %s516_s13, 1  ;;  %p90_p3 = scmp.eq.s32.totalorder %s276_s14, 1 }
   0x9   : > { %p525_p4 = por %p40_p1, %p39_p0  ;;  %p277_p5 = scmp.ge.s32.totalorder %s477_s12, 1 }
   0xa   : > { %p530_p6 = por %p90_p3, %p39_p0  ;;  %p97_p7 = scmp.lt.s32.totalorder %s477_s12, 3 }
   0xb   : > { %s109_s19 = sshll.u32 %s634_s1, 4  ;;  %s479_s21 = smov [#allocation5]   ;;  %s110_s19 = int_to_ptr.hbm [resolvable:$true] %s109_s19 }
   0xc   : > { %p538_p8 = pnand %p277_p5, %p97_p7  ;;  %s111_s22 = sshll.u32 %s479_s21, 4  ;;  %s112_s22 = int_to_ptr.vmem [resolvable:$true] %s111_s22 }
   0xd   : > { %s548_s23 = sadd.s32 1, %s477_s12   ;;  %s26_s24 = sadd.s32 1, %s473_s11 }
   0xe   : > { %p298_p10 = pneg %p538_p8  ;;  %s23_s25 = ssub.s32 %s477_s12, %s548_s23 }
   0xf   : > { %p24_p12 = scmp.eq.s32.totalorder %s23_s25, 0  ;;  %p33_p13 = scmp.ne.s32.totalorder %s473_s11, %s469_s10 }
  0x10   : > { %p299_p11 = pnand %p298_p10, %p40_p1  ;;  %p34_p0 = scmp.eq.s32.totalorder %s477_s12, 0 }
  0x11   : > { %s557_s26 = scalar_select %p24_p12, %s473_s11, %s26_s24  }
  0x12   : > { %301 = dma.hbm_to_vmem [thread:$0]  (!%p299_p11), %s110_s19, 128, %s112_s22, [#allocation6]  }
  0x13   : > { %p561_p3 = por %p84_p2, %p33_p13  ;;  %p311_p5 = scmp.lt.s32.totalorder %s477_s12, 2 }
  0x14   : > { %s122_s28 = sand.u32 1, %s473_s11   ;;  %s281_s29 = sshll.u32 %s477_s12, 3 }
  0x15   : > { %p35_p7 = por %p34_p0, %p33_p13  ;;  %s280_s30 = sshll.u32 %s122_s28, 3 }
  0x16   : > { %s130_s5 = scalar_lea.hbm %s633_s0, %s281_s29  ;;  %s126_s7 = scalar_lea.vmem [#allocation2], %s280_s30 }
  0x17   : > { %s132_s6 = sshll.u32 %s130_s5, 4  ;;  %s134_s8 = sshll.u32 %s126_s7, 4  ;;  %s133_s6 = int_to_ptr.hbm [resolvable:$true] %s132_s6  ;;  %s135_s8 = int_to_ptr.vmem [resolvable:$true] %s134_s8 }
  0x18   : > { %p571_p10 = pnand %p311_p5, %p35_p7  ;;  %s123_s17 = scalar_lea.sflag [#allocation3], %s122_s28 }
  0x19   : > { %s377_s18 = sshra.s32 %s133_s6, 4  ;;  %s384_s24 = scalar_lea.hbm %s633_s0, 16  ;;  %s378_s18 = int_to_ptr.hbm [resolvable:$true] %s377_s18 }
  0x1a   : > { %s379_s19 = scalar_lea.hbm %s378_s18, 8  ;;  %p381_p11 = pneg %p571_p10 }
  0x1b   : > { %p380_p2 = scmp.ne.s32.totalorder %s378_s18, %s379_s19  ;;  %p385_p0 = scmp.lt.s32.totalorder %s378_s18, %s633_s0 }
  0x1c   : > { %p386_p5 = scmp.lt.s32.totalorder %s384_s24, %s379_s19 }
  0x1d   : > { %p382_p12 = pnand %p381_p11, %p380_p2 }
  0x1e   : > { %p387_p7 = por %p386_p5, %p385_p0 }
  0x1f   : > { %p383_p13 = pneg %p382_p12 }
  0x21   : > { %p388_p9 = pnand %p387_p7, %p383_p13 }
  0x23   : > { %391 = shalt.err (!%p388_p9)
}
  0x24   : > { %305 = dma.hbm_to_vmem [thread:$0]  (!%p571_p10), %s133_s6, 128, %s135_s8, %s123_s17  }
  0x25   : > { %143 = sbr.rel (%p538_p8) target bundleno = 60 (0x3c), region = 28  ;;  %s588_s28 = sand.u32 (!%p538_p8), 1, %s469_s10  }
  0x26   : > { %s283_s30 = sshll.u32 (!%p538_p8), %s588_s28, 3  ;;  %s146_s3 = scalar_lea.sflag (!%p538_p8), [#allocation3], %s588_s28 }
  0x27   : > { %s149_s4 = scalar_lea.vmem (!%p538_p8), [#allocation2], %s283_s30 }
  0x2a   : > { %452 = dma.done.wait (%p525_p4), %s146_s3, 128  }
  0x2b   : > { %454 = vsyncadd (%p525_p4), %s146_s3, 4294967168 }
  0x2c   : > { %456 = dma.done.wait (%p40_p1), [#allocation6], 128  }
  0x2d   : > { %458 = vsyncadd (%p40_p1), [#allocation6], 4294967168  ;;  %s287_s20 = sshll.u32 %s516_s13, 3  ;;  %s175_s8 = scalar_lea.vmem [#allocation7], %s283_s30  ;;  %v176_v0 = vld [vmem:[%s149_s4] sm:$0xff]  ;;  %v177_v1 = vld [vmem:[#allocation5] sm:$0xff] }
  0x2e   : > { %s191_s7 = scalar_lea.hbm %s635_s2, %s287_s20  ;;  %s193_s14 = sshll.u32 %s175_s8, 4  ;;  %v178_v2 = vadd.f32 %v177_v1, %v176_v0  ;;  %s194_s14 = int_to_ptr.vmem [resolvable:$true] %s193_s14 }
  0x2f   : > { %s195_s17 = sshll.u32 %s191_s7, 4  ;;  %s181_s15 = scalar_lea.sflag [#allocation4], %s588_s28  ;;  %s196_s17 = int_to_ptr.hbm [resolvable:$true] %s195_s17 }
  0x30   : > { %179 = vst [vmem:[%s175_s8] sm:$0xff] %v178_v2  ;;  %s421_s18 = sshra.s32 %s196_s17, 4  ;;  %s427_s22 = scalar_lea.hbm %s635_s2, 16  ;;  %s422_s18 = int_to_ptr.hbm [resolvable:$true] %s421_s18 }
  0x31   : > { %s423_s19 = scalar_lea.hbm %s422_s18, 8  ;;  %p428_p9 = scmp.lt.s32.totalorder %s422_s18, %s635_s2 }
  0x32   : > { %p424_p1 = scmp.ne.s32.totalorder %s422_s18, %s423_s19  ;;  %p429_p10 = scmp.lt.s32.totalorder %s427_s22, %s423_s19 }
  0x34   : > { %p425_p4 = pnand %p424_p1, %p561_p3  ;;  %p430_p2 = por %p429_p10, %p428_p9 }
  0x36   : > { %p426_p8 = pneg %p425_p4 }
  0x38   : > { %p431_p11 = pnand %p430_p2, %p426_p8 }
  0x3a   : > { %434 = shalt.err (!%p431_p11)
}
  0x3b   : > { %296 = dma.vmem_to_hbm [thread:$0]  (%p561_p3), %s194_s14, 128, %s196_s17, %s181_s15  }
  0x3c PF: > { %s207_s29 = sand.u32 1, %s465_s9   ;;  %p641_p12 = scmp.ge.s32.totalorder %s477_s12, 2 }
  0x3d   : > { %s208_s28 = scalar_lea.sflag [#allocation4], %s207_s29 }
  0x3e   : > { %p307_p13 = pnand %p641_p12, %p530_p6 }
  0x40   : > { %p308_p0 = pneg %p307_p13 }
  0x42   : > { %460 = dma.done.wait (%p308_p0), %s208_s28, 128  }
  0x43   : > { %462 = vsyncadd (%p308_p0), %s208_s28, 4294967168  ;;  %p16_p5 = scmp.ge.s32.totalorder %s548_s23, 4   ;;  %s642_s9 = smov %s469_s10 }
  0x44   : > { %s643_s10 = smov %s473_s11  ;;  %s644_s11 = smov %s557_s26 }
  0x45   : > { %s645_s12 = smov %s548_s23  ;;  %18 = sbr.rel (!%p16_p5) target bundleno = 6 (0x6), region = 77 }
  0x4a   :  { %214 = vsyncpa [#allocation3], 1 }
  0x4b   :  { %216 = vsyncpa [#allocation3 + $0x1], 1 }
  0x4c   :  { %217 = vsyncpa [#allocation6], 1 }
  0x4d   :  { %218 = vsyncpa [#allocation4], 1 }
  0x4e   :  { %220 = vsyncpa [#allocation4 + $0x1], 1 }

// kernel: tpu_custom_call.1
= control target key start
LH: loop header
LB: loop body
LE: loop exit
PB: predicated region body
PF: predicated region fallthrough
CT: control target
= control target key end

     0   :  { %13 = vsyncpa [#allocation3], 0  ;;  %s1257_s0 = inlined_call_operand.hbm [shape: f32[8,128], index: 0, kind: input, shape index: {}]   ;;  %s1258_s1 = inlined_call_operand.hbm [shape: f32[1,768], index: 1, kind: input, shape index: {}]   ;;  %s1259_s2 = inlined_call_operand.hbm [shape: bf16[128,128], index: 2, kind: input, shape index: {}]   ;;  %s1260_s3 = inlined_call_operand.hbm [shape: bf16[128,128], index: 3, kind: input, shape index: {}]   ;;  %s1261_s4 = inlined_call_operand.hbm [shape: bf16[128,128], index: 4, kind: input, shape index: {}]   ;;  %s1262_s5 = inlined_call_operand.hbm [shape: bf16[128,128], index: 5, kind: input, shape index: {}]   ;;  %s1263_s6 = inlined_call_operand.hbm [shape: bf16[128,128], index: 6, kind: input, shape index: {}]   ;;  %s1264_s7 = inlined_call_operand.hbm [shape: bf16[128,128], index: 7, kind: input, shape index: {}]   ;;  %s1265_s8 = inlined_call_operand.hbm [shape: f32[8,128], index: 8, kind: output, shape index: {}]  }
   0x1   :  { %14 = vsyncpa [#allocation6], 0 }
   0x2   :  { %15 = vsyncpa [#allocation9], 0 }
   0x3   :  { %16 = vsyncpa [#allocation12], 0 }
   0x4   :  { %17 = vsyncpa [#allocation15], 0  ;;  %s35_s29 = sshll.u32 %s1258_s1, 4  ;;  %s36_s29 = int_to_ptr.hbm [resolvable:$true] %s35_s29 }
   0x5   :  { %18 = vsyncpa [#allocation4], 0  ;;  %s1156_s30 = smov [#allocation5]   ;;  %s58_s12 = sshll.u32 %s1260_s3, 4  ;;  %s59_s12 = int_to_ptr.hbm [resolvable:$true] %s58_s12 }
   0x6   :  { %s37_s9 = sshll.u32 %s1156_s30, 4  ;;  %s1157_s13 = smov [#allocation8]   ;;  %s38_s9 = int_to_ptr.vmem [resolvable:$true] %s37_s9 }
   0x7   :  { %40 = dma.hbm_to_vmem [thread:$0]  %s36_s29, 96, %s38_s9, [#allocation6]  }
   0x8   :  { %s60_s14 = sshll.u32 %s1157_s13, 4  ;;  %s84_s17 = sshll.u32 %s1262_s5, 4  ;;  %s61_s14 = int_to_ptr.vmem [resolvable:$true] %s60_s14  ;;  %s85_s17 = int_to_ptr.hbm [resolvable:$true] %s84_s17 }
   0x9   :  { %s1158_s1 = smov 64   ;;  %s1159_s18 = smov 4  }
   0xa   :  { %66 = dma.hbm_to_vmem [thread:$0]  %s59_s12, 1024, %s61_s14, [#allocation9], %s1158_s1, %s1158_s1, %s1159_s18  }
   0xb   :  { %s24_s21 = sshll.u32 %s1257_s0, 4  ;;  %s1160_s3 = smov [#allocation11]   ;;  %s25_s21 = int_to_ptr.hbm [resolvable:$true] %s24_s21 }
   0xc   :  { %s86_s22 = sshll.u32 %s1160_s3, 4  ;;  %s1161_s5 = smov [#allocation2]   ;;  %s87_s22 = int_to_ptr.vmem [resolvable:$true] %s86_s22 }
   0xd   :  { %92 = dma.hbm_to_vmem [thread:$0]  %s85_s17, 1024, %s87_s22, [#allocation12], %s1158_s1, %s1158_s1, %s1159_s18  }
   0xe   :  { %s26_s23 = sshll.u32 %s1161_s5, 4  ;;  %s45_s26 = sshll.u32 %s1259_s2, 4  ;;  %s27_s23 = int_to_ptr.vmem [resolvable:$true] %s26_s23  ;;  %s46_s26 = int_to_ptr.hbm [resolvable:$true] %s45_s26 }
   0xf   :  { %29 = dma.hbm_to_vmem [thread:$0]  %s25_s21, 128, %s27_s23, [#allocation3]  }
  0x10   :  { %s71_s0 = sshll.u32 %s1261_s4, 4  ;;  %s1162_s29 = smov [#allocation7]   ;;  %s72_s0 = int_to_ptr.hbm [resolvable:$true] %s71_s0 }
  0x11   :  { %s47_s30 = sshll.u32 %s1162_s29, 4  ;;  %s1163_s9 = smov [#allocation10]   ;;  %s48_s30 = int_to_ptr.vmem [resolvable:$true] %s47_s30 }
  0x12   :  { %53 = dma.hbm_to_vmem [thread:$0]  %s46_s26, 1024, %s48_s30, [#allocation6], %s1158_s1, %s1158_s1, %s1159_s18  }
  0x13   :  { %s73_s10 = sshll.u32 %s1163_s9, 4  ;;  %s97_s2 = sshll.u32 %s1263_s6, 4  ;;  %s74_s10 = int_to_ptr.vmem [resolvable:$true] %s73_s10  ;;  %s98_s2 = int_to_ptr.hbm [resolvable:$true] %s97_s2 }
  0x14   :  { %79 = dma.hbm_to_vmem [thread:$0]  %s72_s0, 1024, %s74_s10, [#allocation9], %s1158_s1, %s1158_s1, %s1159_s18  }
  0x15   :  { %s110_s14 = sshll.u32 %s1264_s7, 4  ;;  %s1164_s15 = smov [#allocation13]   ;;  %s111_s14 = int_to_ptr.hbm [resolvable:$true] %s110_s14 }
  0x16   :  { %s99_s16 = sshll.u32 %s1164_s15, 4  ;;  %s1165_s17 = smov [#allocation14]   ;;  %s100_s16 = int_to_ptr.vmem [resolvable:$true] %s99_s16 }
  0x17   :  { %105 = dma.hbm_to_vmem [thread:$0]  %s98_s2, 1024, %s100_s16, [#allocation12], %s1158_s1, %s1158_s1, %s1159_s18  }
  0x18   :  { %s112_s6 = sshll.u32 %s1165_s17, 4  ;;  %s113_s6 = int_to_ptr.vmem [resolvable:$true] %s112_s6 }
  0x19   :  { %118 = dma.hbm_to_vmem [thread:$0]  %s111_s14, 1024, %s113_s6, [#allocation15], %s1158_s1, %s1158_s1, %s1159_s18  }
  0x1a   :  { %1144 = dma.done.wait [#allocation3], 128  }
  0x1b   :  { %1145 = vsyncadd [#allocation3], 4294967168 }
  0x1c   :  { %1146 = dma.done.wait [#allocation6], 1120  }
  0x1d   :  { %1147 = vsyncadd [#allocation6], 4294966176 }
  0x1e   :  { %1148 = dma.done.wait [#allocation9], 2048  }
  0x1f   :  { %1149 = vsyncadd [#allocation9], 4294965248 }
  0x20   :  { %1150 = dma.done.wait [#allocation12], 2048  }
  0x21   :  { %1151 = vsyncadd [#allocation12], 4294965248 }
  0x22   :  { %1152 = dma.done.wait [#allocation15], 1024  }
  0x23   :  { %1153 = vsyncadd [#allocation15], 4294966272  ;;  %v870_v0 = vld [vmem:[#allocation7 + $0x38] sm:$0xff]  ;;  %v869_v1 = vld [vmem:[#allocation7 + $0x30] sm:$0xff]  ;;  %s1166_s7 = smov [#allocation16]   ;;  %s657_s20 = sshll.u32 %s1265_s8, 4  ;;  %s658_s20 = int_to_ptr.hbm [resolvable:$true] %s657_s20 }
  0x24   :  { %221 = vmatpush.bf16.msra.mxu0 %v870_v0  ;;  %v878_v2 = vld [vmem:[#allocation8 + $0x38] sm:$0xff]  ;;  %v868_v3 = vld [vmem:[#allocation7 + $0x28] sm:$0xff]  ;;  %v877_v4 = vld [vmem:[#allocation8 + $0x30] sm:$0xff]  ;;  %s655_s1 = sshll.u32 %s1166_s7, 4  ;;  %s656_s1 = int_to_ptr.vmem [resolvable:$true] %s655_s1 }
  0x25   :  { %304 = vmatpush.bf16.msra.mxu1 %v878_v2  ;;  %v876_v5 = vld [vmem:[#allocation8 + $0x28] sm:$0xff]  ;;  %v867_v6 = vld [vmem:[#allocation7 + $0x20] sm:$0xff]  ;;  %v866_v8 = vld [vmem:[#allocation7 + $0x18] sm:$0xff] }
  0x26   :  { %v875_v7 = vld [vmem:[#allocation8 + $0x20] sm:$0xff]  ;;  %v874_v9 = vld [vmem:[#allocation8 + $0x18] sm:$0xff]  ;;  %v865_v10 = vld [vmem:[#allocation7 + $0x10] sm:$0xff] }
  0x27   :  { %v873_v11 = vld [vmem:[#allocation8 + $0x10] sm:$0xff]  ;;  %v864_v12 = vld [vmem:[#allocation7 + $0x8] sm:$0xff]  ;;  %v863_v13 = vld [vmem:[#allocation7] sm:$0xff] }
  0x28   :  { %222 = vmatpush.bf16.msra.mxu0 %v869_v1  ;;  %v151_v14 = vld [vmem:[#allocation2] sm:$0xff]  ;;  %v872_v16 = vld [vmem:[#allocation8 + $0x8] sm:$0xff]  ;;  %v871_v17 = vld [vmem:[#allocation8] sm:$0xff] }
  0x29   :  { %305 = vmatpush.bf16.msra.mxu1 %v877_v4  ;;  %v152_v15 = vpack.c.bf16 %v151_v14, %v151_v14  ;;  %v886_v18 = vld [vmem:[#allocation10 + $0x38] sm:$0xff]  ;;  %v885_v20 = vld [vmem:[#allocation10 + $0x30] sm:$0xff]  ;;  %v884_v22 = vld [vmem:[#allocation10 + $0x28] sm:$0xff] }
  0x2a   :  { %v902_v19 = vld [vmem:[#allocation13 + $0x38] sm:$0xff]  ;;  %388 = vmatpush.bf16.msra.mxu2 %v886_v18  ;;  %v901_v21 = vld [vmem:[#allocation13 + $0x30] sm:$0xff]  ;;  %v900_v23 = vld [vmem:[#allocation13 + $0x28] sm:$0xff] }
  0x2b   :  { %v883_v24 = vld [vmem:[#allocation10 + $0x20] sm:$0xff]  ;;  %v882_v26 = vld [vmem:[#allocation10 + $0x18] sm:$0xff]  ;;  %v881_v28 = vld [vmem:[#allocation10 + $0x10] sm:$0xff] }
  0x2c   :  { %223 = vmatpush.bf16.msra.mxu0 %v868_v3  ;;  %v899_v25 = vld [vmem:[#allocation13 + $0x20] sm:$0xff]  ;;  %v898_v27 = vld [vmem:[#allocation13 + $0x18] sm:$0xff]  ;;  %v897_v29 = vld [vmem:[#allocation13 + $0x10] sm:$0xff] }
  0x2d   :  { %306 = vmatpush.bf16.msra.mxu1 %v876_v5  ;;  %v922_v30 = vld [vmem:[#allocation5] ss:$0 sm:$0xff]  ;;  %v880_v36 = vld [vmem:[#allocation10 + $0x8] sm:$0xff]  ;;  %v879_v38 = vld [vmem:[#allocation10] sm:$0xff] }
  0x2e   :  { %389 = vmatpush.bf16.msra.mxu2 %v885_v20  ;;  %v896_v37 = vld [vmem:[#allocation13 + $0x8] sm:$0xff]  ;;  %v895_v39 = vld [vmem:[#allocation13] sm:$0xff]  ;;  %v894_v40 = vld [vmem:[#allocation11 + $0x38] sm:$0xff] }
  0x2f   :  { %471 = vmatpush.bf16.msra.mxu3 %v894_v40  ;;  %v893_v41 = vld [vmem:[#allocation11 + $0x30] sm:$0xff]  ;;  %v892_v42 = vld [vmem:[#allocation11 + $0x28] sm:$0xff]  ;;  %v891_v43 = vld [vmem:[#allocation11 + $0x20] sm:$0xff] }
  0x30   :  { %224 = vmatpush.bf16.msra.mxu0 %v867_v6  ;;  %v890_v44 = vld [vmem:[#allocation11 + $0x18] sm:$0xff]  ;;  %v889_v52 = vld [vmem:[#allocation11 + $0x10] sm:$0xff]  ;;  %v888_v53 = vld [vmem:[#allocation11 + $0x8] sm:$0xff] }
  0x31   :  { %307 = vmatpush.bf16.msra.mxu1 %v875_v7  ;;  %v923_v45 = vld [vmem:[#allocation5 + $0x1] ss:$0 sm:$0xff]  ;;  %v887_v54 = vld [vmem:[#allocation11] sm:$0xff]  ;;  %v909_v56 = vld [vmem:[#allocation14 + $0x30] sm:$0xff] }
  0x32   :  { %390 = vmatpush.bf16.msra.mxu2 %v884_v22  ;;  %v910_v55 = vld [vmem:[#allocation14 + $0x38] sm:$0xff]  ;;  %v908_v57 = vld [vmem:[#allocation14 + $0x28] sm:$0xff]  ;;  %v907_v58 = vld [vmem:[#allocation14 + $0x20] sm:$0xff] }
  0x33   :  { %472 = vmatpush.bf16.msra.mxu3 %v893_v41  ;;  %v906_v59 = vld [vmem:[#allocation14 + $0x18] sm:$0xff]  ;;  %v905_v61 = vld [vmem:[#allocation14 + $0x10] sm:$0xff]  ;;  %v904_v5 = vld [vmem:[#allocation14 + $0x8] sm:$0xff] }
  0x34   :  { %225 = vmatpush.bf16.msra.mxu0 %v866_v8  ;;  %v925_v62 = vld [vmem:[#allocation5 + $0x2] ss:$0 sm:$0xff]  ;;  %v903_v6 = vld [vmem:[#allocation14] sm:$0xff]  ;;  %v924_v7 = vld [vmem:[#allocation5 + $0x4] ss:$0 sm:$0xff] }
  0x35   :  { %308 = vmatpush.bf16.msra.mxu1 %v874_v9  ;;  %v926_v8 = vld [vmem:[#allocation5 + $0x3] ss:$0 sm:$0xff] }
  0x36   :  { %391 = vmatpush.bf16.msra.mxu2 %v883_v24 }
  0x37   :  { %473 = vmatpush.bf16.msra.mxu3 %v892_v42 }
  0x38   :  { %226 = vmatpush.bf16.msra.mxu0 %v865_v10 }
  0x39   :  { %309 = vmatpush.bf16.msra.mxu1 %v873_v11 }
  0x3a   :  { %392 = vmatpush.bf16.msra.mxu2 %v882_v26 }
  0x3b   :  { %474 = vmatpush.bf16.msra.mxu3 %v891_v43 }
  0x3c   :  { %227 = vmatpush.bf16.msra.mxu0 %v864_v12 }
  0x3d   :  { %310 = vmatpush.bf16.msra.mxu1 %v872_v16  ;;  %v927_v16 = vld [vmem:[#allocation5 + $0x5] ss:$0 sm:$0xff] }
  0x3e   :  { %393 = vmatpush.bf16.msra.mxu2 %v881_v28 }
  0x3f   :  { %475 = vmatpush.bf16.msra.mxu3 %v890_v44 }
  0x40   :  { %228 = vmatpush.bf16.msra.mxu0 %v863_v13 }
  0x41   :  { %311 = vmatpush.bf16.msra.mxu1 %v871_v17 }
  0x42   :  { %394 = vmatpush.bf16.msra.mxu2 %v880_v36 }
  0x43   :  { %229 = vmatmul.bf16.vlgmr.msra.gmra.mxu0 %v152_v15  ;;  %476 = vmatpush.bf16.msra.mxu3 %v889_v52 }
  0x44   :  { %552 = vmatpush.bf16.msrb.mxu0 %v902_v19 }
  0x45   :  { %636 = vmatpush.bf16.msrb.mxu1 %v910_v55 }
  0x46   :  { %395 = vmatpush.bf16.msra.mxu2 %v879_v38 }
  0x47   :  { %477 = vmatpush.bf16.msra.mxu3 %v888_v53 }
  0x48   :  { %553 = vmatpush.bf16.msrb.mxu0 %v901_v21 }
  0x49   :  { %637 = vmatpush.bf16.msrb.mxu1 %v909_v56 }
  0x4b   :  { %478 = vmatpush.bf16.msra.mxu3 %v887_v54 }
  0x4c   :  { %554 = vmatpush.bf16.msrb.mxu0 %v900_v23 }
  0x4d   :  { %638 = vmatpush.bf16.msrb.mxu1 %v908_v57 }
  0x50   :  { %555 = vmatpush.bf16.msrb.mxu0 %v899_v25 }
  0x51   :  { %639 = vmatpush.bf16.msrb.mxu1 %v907_v58 }
  0x54   :  { %556 = vmatpush.bf16.msrb.mxu0 %v898_v27 }
  0x55   :  { %640 = vmatpush.bf16.msrb.mxu1 %v906_v59 }
  0x58   :  { %557 = vmatpush.bf16.msrb.mxu0 %v897_v29 }
  0x59   :  { %641 = vmatpush.bf16.msrb.mxu1 %v905_v61 }
  0x5c   :  { %558 = vmatpush.bf16.msrb.mxu0 %v896_v37 }
  0x5d   :  { %642 = vmatpush.bf16.msrb.mxu1 %v904_v5 }
  0x60   :  { %559 = vmatpush.bf16.msrb.mxu0 %v895_v39 }
  0x61   :  { %643 = vmatpush.bf16.msrb.mxu1 %v903_v6 }
  0xc0   :  { %v230_v31 = vpop.f32.mrf.mxu0 }
  0xc1   :  { %v231_v32 = vadd.f32 %v922_v30, %v230_v31 }
  0xc3   :  { %v234_v33 = vmax.f32 %v231_v32, 0.0 }
  0xc5   :  { %v235_v34 = vpack.c.bf16 %v234_v33, %v234_v33 }
  0xc7   :  { %312 = vmatmul.bf16.vlgmr.msra.gmra.mxu1 %v235_v34 }
  0xc8   :  { %v232_v35 = vpop.f32.mrf.mxu0 }
 0x144   :  { %v313_v46 = vpop.f32.mrf.mxu1 }
 0x145   :  { %v314_v47 = vadd.f32 %v923_v45, %v313_v46 }
 0x147   :  { %v317_v48 = vadd.f32 %v314_v47, %v151_v14 }
 0x149   :  { %v318_v49 = vmax.f32 %v317_v48, 0.0 }
 0x14b   :  { %v319_v50 = vpack.c.bf16 %v318_v49, %v318_v49 }
 0x14c   :  { %v315_v51 = vpop.f32.mrf.mxu1 }
 0x14d   :  { %396 = vmatmul.bf16.vlgmr.msra.gmra.mxu2 %v319_v50  ;;  %560 = vmatmul.bf16.vlgmr.msrb.gmra.mxu0 %v319_v50 }
 0x1ca   :  { %v561_v60 = vpop.f32.mrf.mxu0 }
 0x1cb   :  { %v562_v10 = vadd.f32 %v924_v7, %v561_v60 }
 0x1d0   :  { %v397_v63 = vpop.f32.mrf.mxu2 }
 0x1d1   :  { %v398_v0 = vadd.f32 %v925_v62, %v397_v63 }
 0x1d2   :  { %v563_v1 = vpop.f32.mrf.mxu0 }
 0x1d3   :  { %v401_v2 = vmax.f32 %v398_v0, 0.0 }
 0x1d5   :  { %v402_v3 = vpack.c.bf16 %v401_v2, %v401_v2 }
 0x1d7   :  { %479 = vmatmul.bf16.vlgmr.msra.gmra.mxu3 %v402_v3 }
 0x1d8   :  { %v399_v4 = vpop.f32.mrf.mxu2 }
 0x25a   :  { %v480_v9 = vpop.f32.mrf.mxu3 }
 0x25b   :  { %v481_v11 = vadd.f32 %v926_v8, %v480_v9 }
 0x25d   :  { %v565_v12 = vadd.f32 %v562_v10, %v481_v11 }
 0x25f   :  { %v566_v13 = vmax.f32 %v565_v12, 0.0 }
 0x261   :  { %v567_v14 = vpack.c.bf16 %v566_v13, %v566_v13 }
 0x262   :  { %v482_v15 = vpop.f32.mrf.mxu3 }
 0x263   :  { %644 = vmatmul.bf16.vlgmr.msrb.gmra.mxu1 %v567_v14 }
 0x2e0   :  { %v645_v17 = vpop.f32.mrf.mxu1 }
 0x2e1   :  { %v646_v18 = vadd.f32 %v927_v16, %v645_v17 }
 0x2e3   :  { %649 = vst [vmem:[#allocation16] sm:$0xff] %v646_v18 }
 0x2e4   :  { %660 = dma.vmem_to_hbm [thread:$0]  %s656_s1, 128, %s658_s20, [#allocation4]  }
 0x2e8   :  { %v647_v19 = vpop.f32.mrf.mxu1 }
 0x2e9   :  { %1154 = dma.done.wait [#allocation4], 128  }
 0x2ea   :  { %1155 = vsyncadd [#allocation4], 4294967168 }
 0x2eb   :  { %665 = vsyncpa [#allocation3], 1 }
 0x2ec   :  { %666 = vsyncpa [#allocation6], 1 }
 0x2ed   :  { %667 = vsyncpa [#allocation9], 1 }
 0x2ee   :  { %668 = vsyncpa [#allocation12], 1 }
 0x2ef   :  { %669 = vsyncpa [#allocation15], 1 }
 0x2f0   :  { %670 = vsyncpa [#allocation4], 1 }

</bundles_post_ra>
